<compile_context>
chip_gen: v7x
topology: tpu7x:2x2x1
jax: 0.10.0
libtpu: 0.0.40
codegen_flags: <defaults>
</compile_context>

<pallas_src>
import functools
import math

import jax
import jax.numpy as jnp
from jax.experimental import pallas as pl
from jax.experimental.pallas import tpu as pltpu


def _round_up(x, m):
    return ((x + m - 1) // m) * m


def _apply_act(x, activation):
    if activation == 'relu':
        return jnp.maximum(x, 0.0)
    if activation == 'sigmoid':
        return jax.nn.sigmoid(x)
    if activation == 'tanh':
        return jnp.tanh(x)
    return x


# ----------------------------------------------------------------------------
# Pallas matmul (bf16 operands, f32 accumulation, fused bias/scale/activation)
# ----------------------------------------------------------------------------
def _mm_kernel(a_ref, b_ref, bias_ref, o_ref, *, activation, k_steps, scale):
    if k_steps == 1:
        acc = jnp.dot(a_ref[0], b_ref[0], preferred_element_type=jnp.float32)
        if scale != 1.0:
            acc = acc * scale
        o_ref[0] = _apply_act(acc + bias_ref[0], activation)
    else:
        k = pl.program_id(3)

        @pl.when(k == 0)
        def _init():
            o_ref[...] = jnp.zeros_like(o_ref)

        o_ref[0] += jnp.dot(a_ref[0], b_ref[0], preferred_element_type=jnp.float32)

        @pl.when(k == k_steps - 1)
        def _fin():
            acc = o_ref[0]
            if scale != 1.0:
                acc = acc * scale
            o_ref[0] = _apply_act(acc + bias_ref[0], activation)


def _pick_tm(mp):
    # Largest tile <= 512 that divides Mp while keeping >= 2 M-blocks (dual-TC).
    for t in (512, 384, 256, 128):
        if t <= mp and mp % t == 0 and mp // t >= 2:
            return t
    return mp


def pallas_matmul(a, b, bias=None, activation=None, scale=1.0):
    """out = act(scale * (a @ b) + bias).

    a: (M, K) or (B, M, K); b: (K, N) or (B, K, N); bias: (N,).  Returns f32.
    """
    assert a.ndim == b.ndim
    batched = a.ndim == 3
    if not batched:
        a, b = a[None], b[None]
    B, M, K = a.shape
    Bb, K2, N = b.shape
    assert K == K2 and Bb == B

    Mp = _round_up(M, 128)
    Kp = _round_up(K, 128)
    Np = _round_up(N, 128)
    tm = _pick_tm(Mp)
    # Full-N block (weights are narrow in this model) -> the big A tile is never
    # re-streamed across N; otherwise fall back to a 128-multiple divisor.
    tn = Np if Np <= 768 else next(t for t in (512, 256, 128) if Np % t == 0)
    # Single k-step whenever the padded contraction fits a tile (always true here).
    tk = Kp if Kp <= 2560 else next(t for t in (1024, 512, 256, 128) if Kp % t == 0)
    k_steps = Kp // tk

    a_p = jnp.pad(a.astype(jnp.bfloat16), ((0, 0), (0, Mp - M), (0, Kp - K)))
    b_p = jnp.pad(b.astype(jnp.bfloat16), ((0, 0), (0, Kp - K), (0, Np - N)))
    if bias is None:
        bias = jnp.zeros((N,), jnp.float32)
    bias_p = jnp.pad(bias.astype(jnp.float32), (0, Np - N)).reshape(1, 1, Np)

    # Explicit VMEM budget (double-buffered bf16 inputs + resident f32 output).
    est = 2 * (tm * tk * 2 + tk * tn * 2) + 2 * (tm * tn * 4) + 2 * tn * 4
    vmem_limit = int(min(48 * 1024 * 1024, 2 * est + 8 * 1024 * 1024))

    out = pl.pallas_call(
        functools.partial(_mm_kernel, activation=activation, k_steps=k_steps,
                          scale=float(scale)),
        out_shape=jax.ShapeDtypeStruct((B, Mp, Np), jnp.float32),
        grid=(B, Np // tn, Mp // tm, k_steps),        # N-outer: small B tile re-streams
        in_specs=[pl.BlockSpec((1, tm, tk), lambda bt, j, i, k: (bt, i, k)),
                  pl.BlockSpec((1, tk, tn), lambda bt, j, i, k: (bt, k, j)),
                  pl.BlockSpec((1, 1, tn), lambda bt, j, i, k: (0, 0, j))],
        out_specs=pl.BlockSpec((1, tm, tn), lambda bt, j, i, k: (bt, i, j)),
        compiler_params=pltpu.CompilerParams(
            dimension_semantics=("parallel", "parallel", "parallel", "arbitrary"),
            vmem_limit_bytes=vmem_limit),
    )(a_p, b_p, bias_p)
    out = out[:, :M, :N]
    return out if batched else out[0]


# ----------------------------------------------------------------------------
# Pallas elementwise kernels (lane-dense 512-wide blocks)
# ----------------------------------------------------------------------------
def _elt_layout(n, w=512):
    rows = -(-n // w)
    rt = min(1024, _round_up(rows, 8))
    rows_p = _round_up(rows, rt)
    return w, rows_p, rt


def _act_kernel(x_ref, o_ref, *, act):
    o_ref[...] = _apply_act(x_ref[...], act)


def pallas_act(x, act):
    shape = x.shape
    flat = x.reshape(-1).astype(jnp.float32)
    n = flat.shape[0]
    w, rows_p, rt = _elt_layout(n)
    xp = jnp.pad(flat, (0, rows_p * w - n)).reshape(rows_p, w)
    out = pl.pallas_call(
        functools.partial(_act_kernel, act=act),
        out_shape=jax.ShapeDtypeStruct((rows_p, w), jnp.float32),
        grid=(rows_p // rt,),
        in_specs=[pl.BlockSpec((rt, w), lambda i: (i, 0))],
        out_specs=pl.BlockSpec((rt, w), lambda i: (i, 0)),
        compiler_params=pltpu.CompilerParams(dimension_semantics=("parallel",)),
    )(xp)
    return out.reshape(-1)[:n].reshape(shape)


def _add_act_kernel(x_ref, y_ref, o_ref, *, act):
    o_ref[...] = _apply_act(x_ref[...] + y_ref[...], act)


def pallas_add_act(x, y, act='relu'):
    """One-pass fused residual add + activation (saves two HBM round-trips)."""
    shape = x.shape
    xf = x.reshape(-1).astype(jnp.float32)
    yf = y.reshape(-1).astype(jnp.float32)
    n = xf.shape[0]
    w, rows_p, rt = _elt_layout(n)
    pad = rows_p * w - n
    xp = jnp.pad(xf, (0, pad)).reshape(rows_p, w)
    yp = jnp.pad(yf, (0, pad)).reshape(rows_p, w)
    out = pl.pallas_call(
        functools.partial(_add_act_kernel, act=act),
        out_shape=jax.ShapeDtypeStruct((rows_p, w), jnp.float32),
        grid=(rows_p // rt,),
        in_specs=[pl.BlockSpec((rt, w), lambda i: (i, 0)),
                  pl.BlockSpec((rt, w), lambda i: (i, 0))],
        out_specs=pl.BlockSpec((rt, w), lambda i: (i, 0)),
        compiler_params=pltpu.CompilerParams(dimension_semantics=("parallel",)),
    )(xp, yp)
    return out.reshape(-1)[:n].reshape(shape)


def _gru_kernel(h_ref, z_ref, q_ref, o_ref):
    z = z_ref[...]
    o_ref[...] = (1.0 - z) * h_ref[...] + z * q_ref[...]


def pallas_gru_update(h, z, q):
    """Fused GRU state combine: (1-z)*h + z*q in a single HBM pass."""
    shape = h.shape
    hf = h.reshape(-1).astype(jnp.float32)
    zf = z.reshape(-1).astype(jnp.float32)
    qf = q.reshape(-1).astype(jnp.float32)
    n = hf.shape[0]
    w, rows_p, rt = _elt_layout(n)
    pad = rows_p * w - n
    hp = jnp.pad(hf, (0, pad)).reshape(rows_p, w)
    zp = jnp.pad(zf, (0, pad)).reshape(rows_p, w)
    qp = jnp.pad(qf, (0, pad)).reshape(rows_p, w)
    out = pl.pallas_call(
        _gru_kernel,
        out_shape=jax.ShapeDtypeStruct((rows_p, w), jnp.float32),
        grid=(rows_p // rt,),
        in_specs=[pl.BlockSpec((rt, w), lambda i: (i, 0)),
                  pl.BlockSpec((rt, w), lambda i: (i, 0)),
                  pl.BlockSpec((rt, w), lambda i: (i, 0))],
        out_specs=pl.BlockSpec((rt, w), lambda i: (i, 0)),
        compiler_params=pltpu.CompilerParams(dimension_semantics=("parallel",)),
    )(hp, zp, qp)
    return out.reshape(-1)[:n].reshape(shape)


# ----------------------------------------------------------------------------
# Instance norm kernels (per-(n,c) row normalization over H*W lanes)
# ----------------------------------------------------------------------------
def _inorm_kernel(x_ref, o_ref, *, relu, eps):
    x = x_ref[...]
    mean = jnp.mean(x, axis=1, keepdims=True)
    xc = x - mean
    var = jnp.mean(xc * xc, axis=1, keepdims=True)
    y = xc * jax.lax.rsqrt(var + eps)
    if relu:
        y = jnp.maximum(y, 0.0)
    o_ref[...] = y


def _inorm_xla(x, relu, eps):
    mean = x.mean(axis=(2, 3), keepdims=True)
    var = x.var(axis=(2, 3), keepdims=True)
    y = (x - mean) * jax.lax.rsqrt(var + eps)
    return jnp.maximum(y, 0.0) if relu else y


def instance_norm_act(x, relu=True, eps=1e-5):
    """Fused InstanceNorm2d(affine=False) + optional ReLU, single HBM pass."""
    N, C, H, W = x.shape
    HW = H * W
    if HW % 128 != 0:
        return _inorm_xla(x, relu, eps)
    rows = N * C
    x2 = x.reshape(rows, HW).astype(jnp.float32)
    cap = max(8, (2 * 1024 * 1024) // (HW * 4) // 8 * 8)
    rt = max(8, min(_round_up(rows, 8), cap))
    rows_p = _round_up(rows, rt)
    xp = jnp.pad(x2, ((0, rows_p - rows), (0, 0)))
    out = pl.pallas_call(
        functools.partial(_inorm_kernel, relu=relu, eps=eps),
        out_shape=jax.ShapeDtypeStruct((rows_p, HW), jnp.float32),
        grid=(rows_p // rt,),
        in_specs=[pl.BlockSpec((rt, HW), lambda i: (i, 0))],
        out_specs=pl.BlockSpec((rt, HW), lambda i: (i, 0)),
        compiler_params=pltpu.CompilerParams(dimension_semantics=("parallel",)),
    )(xp)
    return out[:rows].reshape(N, C, H, W)


def _inorm_res_kernel(y_ref, x_ref, o_ref, *, norm_x, eps):
    # relu( x' + relu(IN(y)) ), with x' = IN(x) if norm_x else x.
    y = y_ref[...]
    m = jnp.mean(y, axis=1, keepdims=True)
    yc = y - m
    v = jnp.mean(yc * yc, axis=1, keepdims=True)
    y = jnp.maximum(yc * jax.lax.rsqrt(v + eps), 0.0)
    x = x_ref[...]
    if norm_x:
        mx = jnp.mean(x, axis=1, keepdims=True)
        xc = x - mx
        vx = jnp.mean(xc * xc, axis=1, keepdims=True)
        x = xc * jax.lax.rsqrt(vx + eps)
    o_ref[...] = jnp.maximum(x + y, 0.0)


def fused_inorm_add_relu(y_conv, x_res, norm_x, eps=1e-5):
    """ResidualBlock tail (instance-norm variant) in one pass:
    relu( [IN](x_res) + relu(IN(y_conv)) )."""
    N, C, H, W = y_conv.shape
    HW = H * W
    if HW % 128 != 0:
        y = _inorm_xla(y_conv, True, eps)
        x = _inorm_xla(x_res, False, eps) if norm_x else x_res
        return jnp.maximum(x + y, 0.0)
    rows = N * C
    y2 = y_conv.reshape(rows, HW).astype(jnp.float32)
    x2 = x_res.reshape(rows, HW).astype(jnp.float32)
    cap = max(8, (1 * 1024 * 1024) // (HW * 4) // 8 * 8)
    rt = max(8, min(_round_up(rows, 8), cap))
    rows_p = _round_up(rows, rt)
    yp = jnp.pad(y2, ((0, rows_p - rows), (0, 0)))
    xp = jnp.pad(x2, ((0, rows_p - rows), (0, 0)))
    out = pl.pallas_call(
        functools.partial(_inorm_res_kernel, norm_x=norm_x, eps=eps),
        out_shape=jax.ShapeDtypeStruct((rows_p, HW), jnp.float32),
        grid=(rows_p // rt,),
        in_specs=[pl.BlockSpec((rt, HW), lambda i: (i, 0)),
                  pl.BlockSpec((rt, HW), lambda i: (i, 0))],
        out_specs=pl.BlockSpec((rt, HW), lambda i: (i, 0)),
        compiler_params=pltpu.CompilerParams(dimension_semantics=("parallel",)),
    )(yp, xp)
    return out[:rows].reshape(N, C, H, W)


# ----------------------------------------------------------------------------
# Conv via im2col (bf16) + Pallas matmul (1x1 convs skip im2col)
# ----------------------------------------------------------------------------
def _unfold(x, kh, kw, ph, pw, sh=1, sw=1):
    """torch.nn.functional.unfold ordering: (N, C*kh*kw, Ho*Wo)."""
    N, C, H, W = x.shape
    Ho = (H + 2 * ph - kh) // sh + 1
    Wo = (W + 2 * pw - kw) // sw + 1
    xp = jnp.pad(x, ((0, 0), (0, 0), (ph, ph), (pw, pw)))
    cols = []
    for i in range(kh):
        for j in range(kw):
            cols.append(xp[:, :, i:i + sh * (Ho - 1) + 1:sh,
                              j:j + sw * (Wo - 1) + 1:sw])
    cols = jnp.stack(cols, axis=2)                       # (N, C, kh*kw, Ho, Wo)
    return cols.reshape(N, C * kh * kw, Ho * Wo), Ho, Wo


def conv2d(x, p, stride=1, padding=0, activation=None, w_scale=None):
    """PyTorch-semantics Conv2d (NCHW) with bias; matmul runs in Pallas.
    `w_scale` folds a positive scalar scale (eval-BatchNorm / output scaling)
    into the weights and bias so no separate elementwise pass is needed."""
    w, b = p['w'], p['b']
    if w_scale is not None:
        w = w * w_scale
        b = b * w_scale
    C_out, C_in, kh, kw = w.shape
    sh, sw = (stride, stride) if isinstance(stride, int) else stride
    ph, pw = (padding, padding) if isinstance(padding, int) else padding
    bsz = x.shape[0]
    if kh == 1 and kw == 1 and ph == 0 and pw == 0:
        # 1x1 conv: no im2col, just an (optionally strided) NHWC reshape.
        xs = x if (sh == 1 and sw == 1) else x[:, :, ::sh, ::sw]
        Ho, Wo = xs.shape[2], xs.shape[3]
        a = xs.transpose(0, 2, 3, 1).reshape(bsz * Ho * Wo, C_in).astype(jnp.bfloat16)
    else:
        cols, Ho, Wo = _unfold(x.astype(jnp.bfloat16), kh, kw, ph, pw, sh, sw)
        a = cols.transpose(0, 2, 1).reshape(bsz * Ho * Wo, C_in * kh * kw)
    wmat = w.reshape(C_out, C_in * kh * kw).T.astype(jnp.bfloat16)
    out = pallas_matmul(a, wmat, bias=b, activation=activation)
    return out.reshape(bsz, Ho, Wo, C_out).transpose(0, 3, 1, 2)


def conv2d_multi(x, plist, stride=1, padding=0, activation=None, w_scale=None):
    """Several convs with identical geometry & input: one im2col, one matmul."""
    w = jnp.concatenate([q['w'] for q in plist], axis=0)
    b = jnp.concatenate([q['b'] for q in plist], axis=0)
    out = conv2d(x, {'w': w, 'b': b}, stride=stride, padding=padding,
                 activation=activation, w_scale=w_scale)
    outs, c0 = [], 0
    for q in plist:
        c = q['w'].shape[0]
        outs.append(out[:, c0:c0 + c])
        c0 += c
    return outs


# ----------------------------------------------------------------------------
# Parameter init (deterministic, synthetic)
# ----------------------------------------------------------------------------
def conv_params(key, c_out, c_in, kh, kw):
    kw_, kb_ = jax.random.split(key)
    fan_in = c_in * kh * kw
    w = jax.random.normal(kw_, (c_out, c_in, kh, kw), jnp.float32) / math.sqrt(fan_in)
    b = 0.01 * jax.random.normal(kb_, (c_out,), jnp.float32)
    return {'w': w, 'b': b}


# eval-mode BatchNorm2d with default running stats (mean=0, var=1, gamma=1,
# beta=0) is just x * 1/sqrt(1+eps); fold that scalar into the conv weights.
_BN_EVAL_SCALE = 1.0 / math.sqrt(1.0 + 1e-5)


def init_res_block(key, in_planes, planes, stride):
    k1, k2, k3 = jax.random.split(key, 3)
    p = {'conv1': conv_params(k1, planes, in_planes, 3, 3),
         'conv2': conv_params(k2, planes, planes, 3, 3),
         'stride': stride}
    if stride != 1:
        p['down'] = conv_params(k3, planes, in_planes, 1, 1)
    return p


def res_block_forward(x, p, norm_fn):
    s = p['stride']
    if norm_fn == 'instance':
        y = conv2d(x, p['conv1'], stride=s, padding=1)
        y = instance_norm_act(y, relu=True)
        y = conv2d(y, p['conv2'], stride=1, padding=1)
        if 'down' in p:
            xd = conv2d(x, p['down'], stride=s, padding=0)
            return fused_inorm_add_relu(y, xd, norm_x=True)
        return fused_inorm_add_relu(y, x, norm_x=False)
    # 'batch' (eval): scale folded into weights, relu fused in the matmul
    y = conv2d(x, p['conv1'], stride=s, padding=1, activation='relu',
               w_scale=_BN_EVAL_SCALE)
    y = conv2d(y, p['conv2'], stride=1, padding=1, activation='relu',
               w_scale=_BN_EVAL_SCALE)
    if 'down' in p:
        x = conv2d(x, p['down'], stride=s, padding=0, w_scale=_BN_EVAL_SCALE)
    return pallas_add_act(x, y, 'relu')


def init_encoder(key, in_ch, output_dim):
    ks = jax.random.split(key, 8)
    return {
        'conv1': conv_params(ks[0], 64, in_ch, 7, 7),
        'layer1': [init_res_block(ks[1], 64, 64, 1), init_res_block(ks[2], 64, 64, 1)],
        'layer2': [init_res_block(ks[3], 64, 96, 2), init_res_block(ks[4], 96, 96, 1)],
        'layer3': [init_res_block(ks[5], 96, 128, 2), init_res_block(ks[6], 128, 128, 1)],
        'conv2': conv_params(ks[7], output_dim, 128, 1, 1),
    }


def encoder_forward(x, p, norm_fn):
    if norm_fn == 'instance':
        x = conv2d(x, p['conv1'], stride=2, padding=3)
        x = instance_norm_act(x, relu=True)
    else:
        x = conv2d(x, p['conv1'], stride=2, padding=3, activation='relu',
                   w_scale=_BN_EVAL_SCALE)
    for blk in p['layer1'] + p['layer2'] + p['layer3']:
        x = res_block_forward(x, blk, norm_fn)
    return conv2d(x, p['conv2'], stride=1, padding=0)


def init_update_block(key, hidden_dim=128, cor_planes=324):
    ks = jax.random.split(key, 15)
    return {
        'convc1': conv_params(ks[0], 256, cor_planes, 1, 1),
        'convc2': conv_params(ks[1], 192, 256, 3, 3),
        'convf1': conv_params(ks[2], 128, 2, 7, 7),
        'convf2': conv_params(ks[3], 64, 128, 3, 3),
        'conv':   conv_params(ks[4], hidden_dim - 2, 64 + 192, 3, 3),
        'convz1': conv_params(ks[5], hidden_dim, hidden_dim + 256, 1, 5),
        'convr1': conv_params(ks[6], hidden_dim, hidden_dim + 256, 1, 5),
        'convq1': conv_params(ks[7], hidden_dim, hidden_dim + 256, 1, 5),
        'convz2': conv_params(ks[8], hidden_dim, hidden_dim + 256, 5, 1),
        'convr2': conv_params(ks[9], hidden_dim, hidden_dim + 256, 5, 1),
        'convq2': conv_params(ks[10], hidden_dim, hidden_dim + 256, 5, 1),
        'fh1': conv_params(ks[11], 256, hidden_dim, 3, 3),
        'fh2': conv_params(ks[12], 2, 256, 3, 3),
        'mask1': conv_params(ks[13], 256, hidden_dim, 3, 3),
        'mask2': conv_params(ks[14], 64 * 9, 256, 1, 1),
    }


def update_block_forward(net, inp, corr, flow, p):
    # BasicMotionEncoder (relu fused into Pallas matmul epilogue)
    cor = conv2d(corr, p['convc1'], padding=0, activation='relu')
    cor = conv2d(cor, p['convc2'], padding=1, activation='relu')
    flo = conv2d(flow, p['convf1'], padding=3, activation='relu')
    flo = conv2d(flo, p['convf2'], padding=1, activation='relu')
    out = conv2d(jnp.concatenate([cor, flo], axis=1), p['conv'],
                 padding=1, activation='relu')
    motion_features = jnp.concatenate([out, flow], axis=1)        # 128 channels
    x = jnp.concatenate([inp, motion_features], axis=1)           # 256 channels

    def gru_pass(h, kz, kr, kq, pad):
        hx = jnp.concatenate([h, x], axis=1)
        # z and r share the same hx input and geometry -> one im2col + matmul.
        z, r = conv2d_multi(hx, [p[kz], p[kr]], padding=pad, activation='sigmoid')
        q = conv2d(jnp.concatenate([r * h, x], axis=1), p[kq],
                   padding=pad, activation='tanh')
        return pallas_gru_update(h, z, q)                         # (1-z)*h + z*q fused

    net = gru_pass(net, 'convz1', 'convr1', 'convq1', (0, 2))     # SepConvGRU horizontal
    net = gru_pass(net, 'convz2', 'convr2', 'convq2', (2, 0))     # SepConvGRU vertical

    # FlowHead conv1 and mask-head conv1 share input/geometry -> one matmul.
    df, m = conv2d_multi(net, [p['fh1'], p['mask1']], padding=1, activation='relu')
    delta_flow = conv2d(df, p['fh2'], padding=1)
    up_mask = conv2d(m, p['mask2'], padding=0, w_scale=0.25)      # 0.25 folded in
    return net, up_mask, delta_flow


def init_neck(key, in_ch, feature_size):
    return {'conv': conv_params(key, feature_size, in_ch, 1, 1)}


def neck_forward(x, p):
    # TODO(synk): exact CNNNeck architecture from the RaLF repo is not provided;
    # stand-in = 1x1 conv (Pallas matmul) + ReLU + global-avg-pool + L2 normalize.
    y = conv2d(x, p['conv'], padding=0, activation='relu')
    y = y.mean(axis=(2, 3))
    return y / (jnp.linalg.norm(y, axis=1, keepdims=True) + 1e-12)


# ----------------------------------------------------------------------------
# Correlation volume / lookup (RAFT CorrBlock)
# ----------------------------------------------------------------------------
def bilinear_sampler(img, coords):
    """grid_sample(bilinear, zeros padding, align_corners=True) with pixel coords.
    img: (B, C, H, W); coords: (B, Ho, Wo, 2) in (x, y) order."""
    # TODO(synk): move this gather into a Pallas kernel with scalar-prefetched
    # indices / manual DMA; currently left to XLA (take_along_axis).
    B, C, H, W = img.shape
    x = coords[..., 0]
    y = coords[..., 1]
    x0 = jnp.floor(x)
    y0 = jnp.floor(y)
    x1 = x0 + 1.0
    y1 = y0 + 1.0
    flat = img.reshape(B, C, H * W)

    def gather(xi, yi):
        valid = ((xi >= 0) & (xi <= W - 1) & (yi >= 0) & (yi <= H - 1)).astype(img.dtype)
        xc = jnp.clip(xi, 0, W - 1).astype(jnp.int32)
        yc = jnp.clip(yi, 0, H - 1).astype(jnp.int32)
        idx = (yc * W + xc).reshape(B, 1, -1)
        g = jnp.take_along_axis(flat, jnp.broadcast_to(idx, (B, C, idx.shape[-1])), axis=2)
        g = g.reshape(B, C, *xi.shape[1:])
        return g * valid[:, None]

    wa = (x1 - x) * (y1 - y)
    wb = (x1 - x) * (y - y0)
    wc = (x - x0) * (y1 - y)
    wd = (x - x0) * (y - y0)
    return (gather(x0, y0) * wa[:, None] + gather(x0, y1) * wb[:, None] +
            gather(x1, y0) * wc[:, None] + gather(x1, y1) * wd[:, None])


def avg_pool2(x):
    B, C, H, W = x.shape
    return x.reshape(B, C, H // 2, 2, W // 2, 2).mean(axis=(3, 5))


class CorrBlockJ:
    def __init__(self, fmap1, fmap2, num_levels=4, radius=4):
        self.num_levels = num_levels
        self.radius = radius
        B, C, H, W = fmap1.shape
        f1 = fmap1.reshape(B, C, H * W).transpose(0, 2, 1)   # (B, HW, C)
        f2 = fmap2.reshape(B, C, H * W)                      # (B, C, HW)
        # Single batched Pallas matmul; 1/sqrt(C) fused into the epilogue.
        corr = pallas_matmul(f1, f2, scale=1.0 / math.sqrt(C))
        corr = corr.reshape(B * H * W, 1, H, W)
        self.shape = (B, H, W)
        self.pyramid = [corr]
        for _ in range(num_levels - 1):
            corr = avg_pool2(corr)
            self.pyramid.append(corr)

    def __call__(self, coords):
        B, H, W = self.shape
        r = self.radius
        coords = coords.transpose(0, 2, 3, 1)                # (B, H, W, 2) (x, y)
        dx = jnp.linspace(-r, r, 2 * r + 1, dtype=jnp.float32)
        dy = jnp.linspace(-r, r, 2 * r + 1, dtype=jnp.float32)
        delta = jnp.stack(jnp.meshgrid(dy, dx, indexing='ij'), axis=-1)  # (2r+1, 2r+1, 2)
        out_pyramid = []
        for i in range(self.num_levels):
            centroid = coords.reshape(B * H * W, 1, 1, 2) / (2 ** i)
            coords_lvl = centroid + delta[None]
            c = bilinear_sampler(self.pyramid[i], coords_lvl)  # (BHW, 1, 2r+1, 2r+1)
            out_pyramid.append(c.reshape(B, H, W, -1))
        out = jnp.concatenate(out_pyramid, axis=-1)
        return out.transpose(0, 3, 1, 2).astype(jnp.float32)


# ----------------------------------------------------------------------------
# RaLF model
# ----------------------------------------------------------------------------
def coords_grid(batch, ht, wd):
    ys, xs = jnp.meshgrid(jnp.arange(ht, dtype=jnp.float32),
                          jnp.arange(wd, dtype=jnp.float32), indexing='ij')
    coords = jnp.stack([xs, ys], axis=0)                    # (2, ht, wd), x first
    return jnp.broadcast_to(coords[None], (batch, 2, ht, wd))


class RaLFPallas:
    def __init__(self, cfg, key, in_channels=3):
        self.cfg = dict(cfg)
        self.hidden_dim = 128
        self.context_dim = 128
        self.cfg['corr_levels'] = 4
        self.cfg['corr_radius'] = 4
        self.cfg.setdefault('dropout', 0)
        self.cfg.setdefault('alternate_corr', False)
        ks = jax.random.split(key, 5)
        self.fnet_l = init_encoder(ks[0], in_channels, self.cfg['output_dim'])
        self.fnet_r = init_encoder(ks[1], in_channels, self.cfg['output_dim'])
        self.cnet = init_encoder(ks[2], in_channels, self.hidden_dim + self.context_dim)
        cor_planes = self.cfg['corr_levels'] * (2 * self.cfg['corr_radius'] + 1) ** 2
        self.update = init_update_block(ks[3], hidden_dim=self.hidden_dim,
                                        cor_planes=cor_planes)
        self.neck = init_neck(ks[4], self.cfg['output_dim'], self.cfg['neck_feature_size'])

    def initialize_flow(self, img):
        N, _, H, W = img.shape
        return coords_grid(N, H // 8, W // 8), coords_grid(N, H // 8, W // 8)

    def upsample_flow(self, flow, mask):
        N, _, H, W = flow.shape
        mask = mask.reshape(N, 1, 9, 8, 8, H, W)
        mask = jax.nn.softmax(mask, axis=2)
        up_flow, _, _ = _unfold(8.0 * flow, 3, 3, 1, 1)
        up_flow = up_flow.reshape(N, 2, 9, 1, 1, H, W)
        up_flow = jnp.sum(mask * up_flow, axis=2)
        up_flow = up_flow.transpose(0, 1, 4, 2, 5, 3)
        return up_flow.reshape(N, 2, 8 * H, 8 * W)

    def forward(self, lidar_, radar_, iters=12, flow_init=None):
        lidar_ = 2.0 * lidar_ - 1.0
        radar_ = 2.0 * radar_ - 1.0
        fmapl = encoder_forward(lidar_, self.fnet_l, 'instance').astype(jnp.float32)
        fmapr = encoder_forward(radar_, self.fnet_r, 'instance').astype(jnp.float32)
        corr_fn = CorrBlockJ(fmapl, fmapr, num_levels=self.cfg['corr_levels'],
                             radius=self.cfg['corr_radius'])
        cnet = encoder_forward(lidar_, self.cnet, 'batch')
        net = pallas_act(cnet[:, :self.hidden_dim], 'tanh')
        inp = pallas_act(cnet[:, self.hidden_dim:], 'relu')
        coords0, coords1 = self.initialize_flow(lidar_)
        if flow_init is not None:
            coords1 = coords1 + flow_init
        flow_predictions = []
        for _ in range(iters):
            corr = corr_fn(coords1)
            flow = coords1 - coords0
            net, up_mask, delta_flow = update_block_forward(net, inp, corr, flow, self.update)
            coords1 = coords1 + delta_flow
            flow_up = self.upsample_flow(coords1 - coords0, up_mask)
            flow_predictions.append(flow_up)
        fmapl_e = neck_forward(fmapl, self.neck)
        fmapr_e = neck_forward(fmapr, self.neck)
        return fmapl_e, fmapr_e, flow_predictions


if __name__ == "__main__":
    key = jax.random.PRNGKey(0)
    kp, kl, kr = jax.random.split(key, 3)
    cfg = {'output_dim': 64, 'dropout': 0, 'neck_feature_size': 32}
    model = RaLFPallas(cfg, kp, in_channels=3)
    # H, W = 128 so that the 4-level correlation pyramid (H/8=16 -> 2) stays valid.
    lidar = jax.random.uniform(kl, (1, 3, 128, 128), jnp.float32)
    radar = jax.random.uniform(kr, (1, 3, 128, 128), jnp.float32)
    fmapl_e, fmapr_e, flow_preds = model.forward(lidar, radar, iters=2)
    jax.block_until_ready((fmapl_e, fmapr_e, flow_preds))
    assert flow_preds[-1].shape == (1, 2, 128, 128)
    assert fmapl_e.shape == (1, 32) and fmapr_e.shape == (1, 32)
    print("KERNEL_OK")
</pallas_src>

<mosaic_0001>
module attributes {stable_mosaic.version = 11 : i64} {
  func.func @_mm_kernel(%arg0: i32, %arg1: i32, %arg2: i32, %arg3: i32, %arg4: memref<1x512x256xbf16, #tpu.memory_space<vmem>>, %arg5: memref<1x256x128xbf16, #tpu.memory_space<vmem>>, %arg6: memref<1x1x128xf32, #tpu.memory_space<vmem>>, %arg7: memref<1x512x128xf32, #tpu.memory_space<vmem>>) attributes {dimension_semantics = [#tpu.dimension_semantics<parallel>, #tpu.dimension_semantics<parallel>, #tpu.dimension_semantics<parallel>, #tpu.dimension_semantics<arbitrary>], iteration_bounds = array<i64: 1, 1, 8, 1>, scalar_prefetch = 0 : i64, scratch_operands = 0 : i64, tpu.core_type = #tpu.core_type<tc>, window_params = [{transform_indices = @transform_0, window_bounds = array<i64: 1, 512, 256>}, {transform_indices = @transform_1, window_bounds = array<i64: 1, 256, 128>}, {transform_indices = @transform_2, window_bounds = array<i64: 1, 1, 128>}, {transform_indices = @transform_3, window_bounds = array<i64: 1, 512, 128>}]} {
    %c0 = arith.constant 0 : index
    %c0_0 = arith.constant 0 : index
    %c0_1 = arith.constant 0 : index
    %0 = vector.load %arg4[%c0, %c0_0, %c0_1] : memref<1x512x256xbf16, #tpu.memory_space<vmem>>, vector<1x512x256xbf16>
    %1 = vector.shape_cast %0 : vector<1x512x256xbf16> to vector<512x256xbf16>
    %c0_2 = arith.constant 0 : index
    %c0_3 = arith.constant 0 : index
    %c0_4 = arith.constant 0 : index
    %2 = vector.load %arg5[%c0_2, %c0_3, %c0_4] : memref<1x256x128xbf16, #tpu.memory_space<vmem>>, vector<1x256x128xbf16>
    %3 = vector.shape_cast %2 : vector<1x256x128xbf16> to vector<256x128xbf16>
    %cst = arith.constant dense<0.000000e+00> : vector<512x128xf32>
    %4 = tpu.matmul %1, %3, %cst {dimension_numbers = #tpu.dot_dimension_numbers<[1], [0], [0], [1], [0, 0, 1, 1], [], []>} : vector<512x256xbf16>, vector<256x128xbf16>, vector<512x128xf32> -> vector<512x128xf32>
    %c0_5 = arith.constant 0 : index
    %c0_6 = arith.constant 0 : index
    %c0_7 = arith.constant 0 : index
    %5 = vector.load %arg6[%c0_5, %c0_6, %c0_7] : memref<1x1x128xf32, #tpu.memory_space<vmem>>, vector<1x1x128xf32>
    %6 = vector.shape_cast %5 : vector<1x1x128xf32> to vector<1x128xf32>
    %7 = vector.broadcast %6 : vector<1x128xf32> to vector<512x128xf32>
    %8 = arith.addf %4, %7 : vector<512x128xf32>
    %c0_8 = arith.constant 0 : index
    %c0_9 = arith.constant 0 : index
    %c0_10 = arith.constant 0 : index
    %9 = vector.load %arg7[%c0_8, %c0_9, %c0_10] : memref<1x512x128xf32, #tpu.memory_space<vmem>>, vector<1x512x128xf32>
    %10 = vector.shape_cast %9 : vector<1x512x128xf32> to vector<512x128xf32>
    %11 = vector.shape_cast %8 : vector<512x128xf32> to vector<1x512x128xf32>
    tpu.vector_store %arg7[%c0_8, %c0_9, %c0_10], %11 {strides = array<i32>} : memref<1x512x128xf32, #tpu.memory_space<vmem>>, vector<1x512x128xf32>,
    return
  }
  func.func @transform_0(%arg0: i32, %arg1: i32, %arg2: i32, %arg3: i32) -> (i32, i32, i32) {
    %c0_i32 = arith.constant 0 : i32
    return %arg0, %arg2, %arg3 : i32, i32, i32
  }
  func.func @transform_1(%arg0: i32, %arg1: i32, %arg2: i32, %arg3: i32) -> (i32, i32, i32) {
    %c0_i32 = arith.constant 0 : i32
    return %arg0, %arg3, %arg1 : i32, i32, i32
  }
  func.func @transform_2(%arg0: i32, %arg1: i32, %arg2: i32, %arg3: i32) -> (i32, i32, i32) {
    %c0_i32 = arith.constant 0 : i32
    %c0_i32_0 = arith.constant 0 : i32
    %c0_i32_1 = arith.constant 0 : i32
    return %c0_i32, %c0_i32_0, %arg1 : i32, i32, i32
  }
  func.func @transform_3(%arg0: i32, %arg1: i32, %arg2: i32, %arg3: i32) -> (i32, i32, i32) {
    %c0_i32 = arith.constant 0 : i32
    return %arg0, %arg2, %arg1 : i32, i32, i32
  }
}

</mosaic_0001>

<bundles_post_ra>
// kernel: tpu_custom_call.1
= control target key start
LH: loop header
LB: loop body
LE: loop exit
PB: predicated region body
PF: predicated region fallthrough
CT: control target
= control target key end

     0   :  { %8 = vsyncpa [#allocation3], 0  ;;  %s2319_s0 = inlined_call_operand.hbm [shape: bf16[1,4096,256], index: 0, kind: input, shape index: {}]   ;;  %s2320_s1 = inlined_call_operand.hbm [shape: bf16[1,256,128], index: 1, kind: input, shape index: {}]   ;;  %s2321_s2 = inlined_call_operand.hbm [shape: f32[1,1,128], index: 2, kind: input, shape index: {}]   ;;  %s2322_s3 = inlined_call_operand.hbm [shape: f32[1,4096,128], index: 3, kind: output, shape index: {}]  }
   0x1   :  { %10 = vsyncpa [#allocation3 + $0x1], 0 }
   0x2   :  { %11 = vsyncpa [#allocation6], 0 }
   0x3   :  { %12 = vsyncpa [#allocation4], 0 }
   0x4   :  { %14 = vsyncpa [#allocation4 + $0x1], 0  ;;  %s1837_s12 = smov 0   ;;  %s1839_s13 = smov 0  }
   0x5   :  { %s1841_s14 = smov 0   ;;  %s1843_s15 = smov 0  }
   0x6   :  { %s1845_s16 = smov 0   ;;  %s1847_s17 = smov 0  }
   0x7 LB: > { %s1294_s18 = sadd.s32 4294967295, %s1804_s17   ;;  %s1295_s19 = sadd.s32 4294967294, %s1804_s17   ;;  %s1804_s17 = sphi %s1847_s17, %s20_s17   ;;  %s1800_s16 = sphi %s1845_s16, %s2344_s16   ;;  %s1796_s15 = sphi %s1843_s15, %s2343_s15   ;;  %s1792_s14 = sphi %s1841_s14, %s2342_s14   ;;  %s1788_s13 = sphi %s1839_s13, %s2341_s13   ;;  %s1784_s12 = sphi %s1837_s12, %s2340_s12  }
   0x8   : > { %p70_p0 = scmp.ne.s32.totalorder %s1788_s13, %s1784_s12  ;;  %p1871_p1 = scmp.eq.s32.totalorder %s1294_s18, 0 }
   0x9   : > { %p1875_p2 = scmp.eq.s32.totalorder %s1294_s18, 7  ;;  %p160_p3 = scmp.eq.s32.totalorder %s1295_s19, 7 }
   0xa   : > { %s2327_s20 = scalar_select %p1871_p1, 1, 0 }
   0xb   : > { %s2328_s21 = scalar_select %p1875_p2, 1, 0 }
   0xc   : > { %p1881_p4 = por %p1871_p1, %p70_p0  ;;  %p1296_p5 = scmp.ge.s32.totalorder %s1804_s17, 1 }
   0xd   : > { %p1886_p6 = por %p160_p3, %p70_p0  ;;  %p167_p7 = scmp.lt.s32.totalorder %s1804_s17, 9 }
   0xe   : > { %s2329_s22 = scalar_select %p1881_p4, 1, 0 }
   0xf   : > { %s2330_s23 = scalar_select %p1886_p6, 1, 0 }
  0x10   : > { %p1891_p8 = pnand %p1296_p5, %p167_p7  ;;  %s1806_s25 = smov [#allocation5]  }
  0x11   : > { %s185_s26 = sshll.u32 %s1806_s25, 4  ;;  %s1807_s28 = smov [#allocation7]   ;;  %s186_s26 = int_to_ptr.vmem [resolvable:$true] %s185_s26 }
  0x12   : > { %s2331_s24 = scalar_select %p1891_p8, 1, 0 }
  0x13   : > { %p1442_p9 = pneg %p1891_p8  ;;  %s201_s29 = sshll.u32 %s1807_s28, 4  ;;  %s1903_s29 = int_to_ptr.vmem [resolvable:$true] %s201_s29 }
  0x14   : > { %s1632_s5 = scalar_lea.hbm %s2320_s1, 2048 }
  0x15   : > { %p1899_p10 = pnand %p1442_p9, %p1871_p1  ;;  %p1633_p11 = scmp.ne.s32.totalorder %s2320_s1, %s1632_s5 }
  0x16   : > { %p1639_p3 = scmp.lt.u32.totalorder %s1632_s5, %s2320_s1 }
  0x17   : > { %p1634_p12 = pneg %p1899_p10 }
  0x19   : > { %p1635_p13 = pnand %p1634_p12, %p1633_p11 }
  0x1b   : > { %p1636_p0 = pneg %p1635_p13 }
  0x1d   : > { %p1641_p5 = pnand %p1639_p3, %p1636_p0 }
  0x1f   : > { %1644 = shalt.err (!%p1641_p5)
}
  0x20   : > { %s1645_s10 = scalar_lea.vmem %s186_s26, 2048  ;;  %p1653_p1 = scmp.lt.s32.totalorder %s186_s26, %s186_s26 }
  0x21   : > { %p1646_p7 = scmp.ne.s32.totalorder %s186_s26, %s1645_s10  ;;  %p1654_p4 = scmp.lt.s32.totalorder %s1645_s10, %s1645_s10 }
  0x23   : > { %p1648_p9 = pnand %p1646_p7, %p1634_p12  ;;  %p1655_p8 = por %p1654_p4, %p1653_p1 }
  0x25   : > { %p1649_p6 = pneg %p1648_p9 }
  0x27   : > { %p1656_p2 = pnand %p1655_p8, %p1649_p6 }
  0x29   : > { %1659 = shalt.err (!%p1656_p2)
}
  0x2a   : > { %s1808_s11 = smov 64   ;;  %s1809_s18 = smov 4  }
  0x2b   : > { %1445 = dma.hbm_to_vmem [thread:$0]  (!%p1899_p10), %s2320_s1, 2048, %s186_s26, [#allocation6], %s1808_s11, %s1808_s11, %s1809_s18  }
  0x2c   : > { %s1660_s4 = scalar_lea.hbm %s2321_s2, 16 }
  0x2d   : > { %p1661_p11 = scmp.ne.s32.totalorder %s2321_s2, %s1660_s4  ;;  %p1667_p4 = scmp.lt.u32.totalorder %s1660_s4, %s2321_s2 }
  0x2f   : > { %p1663_p1 = pnand %p1661_p11, %p1634_p12 }
  0x31   : > { %p1664_p2 = pneg %p1663_p1 }
  0x33   : > { %p1669_p6 = pnand %p1667_p4, %p1664_p2 }
  0x35   : > { %1672 = shalt.err (!%p1669_p6)
}
  0x36   : > { %s1673_s26 = scalar_lea.vmem %s1903_s29, 16  ;;  %s1680_s9 = scalar_lea.vmem %s1903_s29, 32 }
  0x37   : > { %p1674_p8 = scmp.ne.s32.totalorder %s1903_s29, %s1673_s26  ;;  %p1681_p3 = scmp.lt.s32.totalorder %s1903_s29, %s1903_s29 }
  0x38   : > { %p1682_p5 = scmp.lt.s32.totalorder %s1680_s9, %s1673_s26 }
  0x39   : > { %p1676_p13 = pnand %p1674_p8, %p1634_p12 }
  0x3a   : > { %p1683_p7 = por %p1682_p5, %p1681_p3 }
  0x3b   : > { %p1677_p0 = pneg %p1676_p13 }
  0x3d   : > { %p1684_p9 = pnand %p1683_p7, %p1677_p0 }
  0x3f   : > { %1687 = shalt.err (!%p1684_p9)
}
  0x40   : > { %1448 = dma.hbm_to_vmem [thread:$0]  (!%p1899_p10), %s2321_s2, 16, %s1903_s29, [#allocation6]  }
  0x41   : > { %s38_s18 = sadd.s32 1, %s1800_s16  ;;  %s57_s19 = sadd.s32 1, %s1792_s14 }
  0x42   : > { %p40_p12 = scmp.ge.s32.totalorder %s38_s18, 8  ;;  %p64_p11 = scmp.ne.s32.totalorder %s1792_s14, %s1788_s13 }
  0x43   : > { %p65_p1 = scmp.eq.s32.totalorder %s1804_s17, 0  ;;  %p1459_p2 = scmp.lt.s32.totalorder %s1804_s17, 8 }
  0x44   : > { %s2346_s18 = smov (%p40_p12, %s38_s18), 0  ;;  %p2333_p6 = scmp.ne.s32.totalorder %s2328_s21, 0 }
  0x45   : > { %p66_p4 = por %p65_p1, %p64_p11  ;;  %s51_s25 = ssub.s32 %s1800_s16, %s2346_s18 }
  0x46   : > { %p1963_p8 = por %p2333_p6, %p64_p11  ;;  %s212_s28 = sand.u32 1, %s1792_s14  }
  0x47   : > { %p55_p13 = scmp.eq.s32.totalorder %s51_s25, 0  ;;  %s1300_s29 = sshll.u32 %s212_s28, 9 }
  0x48   : > { %s1396_s30 = sshll.u32 %s1800_s16, 13  ;;  %s216_s21 = scalar_lea.vmem [#allocation2], %s1300_s29 }
  0x49   : > { %s1972_s4 = scalar_select %p55_p13, %s1792_s14, %s57_s19  }
  0x4a   : > { %s1977_s7 = scalar_lea.hbm %s2319_s0, %s1396_s30  ;;  %s228_s8 = sshll.u32 %s216_s21, 4  ;;  %s1985_s8 = int_to_ptr.vmem [resolvable:$true] %s228_s8 }
  0x4b   : > { %p1981_p10 = pnand %p1459_p2, %p66_p4  ;;  %s1987_s9 = scalar_lea.sflag [#allocation3], %s212_s28 }
  0x4c   : > { %s1688_s10 = scalar_lea.hbm %s1977_s7, 8192  ;;  %s1693_s25 = scalar_lea.hbm %s2319_s0, 65536 }
  0x4d   : > { %p1689_p0 = scmp.ne.s32.totalorder %s1977_s7, %s1688_s10  ;;  %p1690_p3 = pneg %p1981_p10 }
  0x4e   : > { %p1694_p9 = scmp.lt.u32.totalorder %s1977_s7, %s2319_s0  ;;  %p1695_p12 = scmp.lt.u32.totalorder %s1693_s25, %s1688_s10 }
  0x4f   : > { %p1691_p5 = pnand %p1690_p3, %p1689_p0  ;;  %p1697_p1 = scmp.lt.u32.totalorder %s1688_s10, %s1977_s7 }
  0x50   : > { %p1696_p11 = por %p1695_p12, %p1694_p9 }
  0x51   : > { %p1692_p7 = pneg %p1691_p5 }
  0x52   : > { %p1698_p2 = por %p1697_p1, %p1696_p11 }
  0x54   : > { %p1699_p4 = pnand %p1698_p2, %p1692_p7 }
  0x56   : > { %1702 = shalt.err (!%p1699_p4)
}
  0x57   : > { %s1703_s28 = scalar_lea.vmem %s1985_s8, 8192  ;;  %s1810_s5 = smov [#allocation2]  }
  0x58   : > { %p1704_p6 = scmp.ne.s32.totalorder %s1985_s8, %s1703_s28  ;;  %s1708_s6 = sshll.u32 %s1810_s5, 4  ;;  %s1709_s6 = int_to_ptr.vmem [resolvable:$false] %s1708_s6 }
  0x59   : > { %s1710_s21 = scalar_lea.vmem %s1709_s6, 16384  ;;  %p1711_p5 = scmp.lt.s32.totalorder %s1985_s8, %s1709_s6 }
  0x5a   : > { %p1706_p13 = pnand %p1704_p6, %p1690_p3  ;;  %p1712_p9 = scmp.lt.s32.totalorder %s1710_s21, %s1703_s28 }
  0x5c   : > { %p1707_p0 = pneg %p1706_p13  ;;  %p1713_p12 = por %p1712_p9, %p1711_p5 }
  0x5e   : > { %p1714_p11 = pnand %p1713_p12, %p1707_p0 }
  0x60   : > { %1717 = shalt.err (!%p1714_p11)
}
  0x61   : > { %s1811_s10 = smov 128   ;;  %s1812_s11 = smov 8  }
  0x62   : > { %1452 = dma.hbm_to_vmem [thread:$0]  (!%p1981_p10), %s1977_s7, 8192, %s1985_s8, %s1987_s9, %s1811_s10, %s1811_s10, %s1812_s11  }
  0x63   : > { %p2336_p3 = scmp.ne.s32.totalorder %s2331_s24, 0 }
  0x64   : > { %s2018_s19 = sand.u32 (!%p2336_p3), 1, %s1788_s13   ;;  %p2337_p7 = scmp.ne.s32.totalorder (!%p2336_p3), %s2329_s22, 0 }
  0x65   : > { %240 = sbr.rel (%p2336_p3) target bundleno = 528 (0x210), region = 32  ;;  %s1305_s25 = sshll.u32 (!%p2336_p3), %s2018_s19, 9 }
  0x66   : > { %s243_s29 = scalar_lea.sflag (!%p2336_p3), [#allocation3], %s2018_s19  ;;  %s2024_s30 = scalar_lea.vmem (!%p2336_p3), [#allocation2], %s1305_s25 }
  0x6c   : > { %1771 = dma.done.wait (%p2337_p7), %s243_s29, 8192  }
  0x6d   : > { %1773 = vsyncadd (%p2337_p7), %s243_s29, 4294959104  ;;  %p2338_p10 = scmp.ne.s32.totalorder %s2327_s20, 0 }
  0x6f   : > { %1775 = dma.done.wait (%p2338_p10), [#allocation6], 2064  }
  0x70   : > { %1777 = vsyncadd (%p2338_p10), [#allocation6], 4294965232  ;;  %v1813_v0 = vmov 0   ;;  %v1520_v1 = vld [vmem:[#allocation5] sm:$0xff]   ;;  %v1521_v2 = vld [vmem:[#allocation5 + $0x8] sm:$0xff]   ;;  %s2136_s20 = scalar_lea.vmem [#allocation8], %s1305_s25 }
  0x71   : > { %801 = vmatprep.subr.bf16.mxu0 %v1813_v0  ;;  %1398 = vmatprep.subr.bf16.mxu1 %v1813_v0  ;;  %v1522_v3 = vld [vmem:[#allocation5 + $0x10] sm:$0xff]   ;;  %v1523_v4 = vld [vmem:[#allocation5 + $0x18] sm:$0xff]   ;;  %v1524_v5 = vld [vmem:[#allocation5 + $0x20] sm:$0xff]   ;;  %s1397_s22 = sshll.u32 %s1796_s15, 13  ;;  %s1171_s24 = sshll.u32 %s2136_s20, 4  ;;  %s2265_s24 = int_to_ptr.vmem [resolvable:$true] %s1171_s24 }
  0x72   : > { %802 = vmatpush1.bf16.msra.mxu0 %v1520_v1  ;;  %1414 = vmatpush1.bf16.msra.mxu1 %v1520_v1  ;;  %v1538_v6 = vld [vmem:[%s2024_s30 + $0x4] ss:$8 sps:$4 sm:$0xff]   ;;  %v1526_v9 = vld [vmem:[#allocation5 + $0x30] sm:$0xff]   ;;  %v1527_v10 = vld [vmem:[#allocation5 + $0x38] sm:$0xff]   ;;  %s2263_s26 = scalar_lea.hbm %s2322_s3, %s1397_s22  ;;  %s1155_s15 = scalar_lea.sflag [#allocation4], %s2018_s19 }
  0x73   : > { %803 = vmatprep.subr.bf16.mxu0 %v1813_v0  ;;  %1399 = vmatprep.subr.bf16.mxu1 %v1813_v0  ;;  %v1525_v7 = vld [vmem:[#allocation5 + $0x28] sm:$0xff]   ;;  %v1528_v11 = vld [vmem:[#allocation5 + $0x40] sm:$0xff]   ;;  %v1530_v13 = vld [vmem:[#allocation5 + $0x50] sm:$0xff]   ;;  %s1718_s9 = scalar_lea.vmem %s2265_s24, 8192  ;;  %s1814_s28 = smov [#allocation8]  }
  0x74   : > { %v1541_v8 = vld [vmem:[%s2024_s30 + $0x104] ss:$8 sps:$4 sm:$0xff]   ;;  %833 = vmatprep.mubr.bf16.mxu0 %v1538_v6  ;;  %v1531_v14 = vld [vmem:[#allocation5 + $0x58] sm:$0xff]   ;;  %v1534_v17 = vld [vmem:[#allocation5 + $0x70] sm:$0xff]   ;;  %p1719_p1 = scmp.ne.s32.totalorder %s2265_s24, %s1718_s9  ;;  %s1722_s5 = sshll.u32 %s1814_s28, 4  ;;  %s1723_s5 = int_to_ptr.vmem [resolvable:$false] %s1722_s5 }
  0x75   : > { %961 = vmatprep.mubr.bf16.mxu1 %v1541_v8  ;;  %v1529_v12 = vld [vmem:[#allocation5 + $0x48] sm:$0xff]   ;;  %v1532_v15 = vld [vmem:[#allocation5 + $0x60] sm:$0xff]   ;;  %v1535_v18 = vld [vmem:[#allocation5 + $0x78] sm:$0xff]   ;;  %s1724_s6 = scalar_lea.vmem %s1723_s5, 16384  ;;  %p1725_p6 = scmp.lt.s32.totalorder %s2265_s24, %s1723_s5 }
  0x76   : > { %804 = vmatpush1.bf16.msra.mxu0 %v1521_v2  ;;  %1415 = vmatpush1.bf16.msra.mxu1 %v1521_v2  ;;  %v1533_v16 = vld [vmem:[#allocation5 + $0x68] sm:$0xff]   ;;  %v1542_v21 = vld [vmem:[%s2024_s30 + $0x14] ss:$8 sps:$4 sm:$0xff]   ;;  %v1546_v23 = vld [vmem:[%s2024_s30 + $0x10] ss:$8 sps:$4 sm:$0xff]   ;;  %p1720_p2 = pnand %p1719_p1, %p1963_p8  ;;  %p1726_p13 = scmp.lt.s32.totalorder %s1724_s6, %s1718_s9 }
  0x77   : > { %805 = vmatprep.subr.bf16.mxu0 %v1813_v0  ;;  %1400 = vmatprep.subr.bf16.mxu1 %v1813_v0  ;;  %v1536_v19 = vld [vmem:[%s2024_s30] ss:$8 sps:$4 sm:$0xff]   ;;  %v1544_v22 = vld [vmem:[%s2024_s30 + $0x114] ss:$8 sps:$4 sm:$0xff]   ;;  %v1547_v24 = vld [vmem:[%s2024_s30 + $0x110] ss:$8 sps:$4 sm:$0xff]  }
  0x78   : > { %v1539_v20 = vld [vmem:[%s2024_s30 + $0x100] ss:$8 sps:$4 sm:$0xff]   ;;  %v1548_v25 = vld [vmem:[%s2024_s30 + $0x24] ss:$8 sps:$4 sm:$0xff]   ;;  %v1554_v29 = vld [vmem:[%s2024_s30 + $0x34] ss:$8 sps:$4 sm:$0xff]   ;;  %p1721_p4 = pneg %p1720_p2  ;;  %p1727_p0 = por %p1726_p13, %p1725_p6 }
  0x79   : > { %v1550_v26 = vld [vmem:[%s2024_s30 + $0x124] ss:$8 sps:$4 sm:$0xff]   ;;  %v1552_v27 = vld [vmem:[%s2024_s30 + $0x20] ss:$8 sps:$4 sm:$0xff]   ;;  %v1556_v30 = vld [vmem:[%s2024_s30 + $0x134] ss:$8 sps:$4 sm:$0xff]  }
  0x7a   : > { %806 = vmatpush1.bf16.msra.mxu0 %v1522_v3  ;;  %1416 = vmatpush1.bf16.msra.mxu1 %v1522_v3  ;;  %v1553_v28 = vld [vmem:[%s2024_s30 + $0x120] ss:$8 sps:$4 sm:$0xff]   ;;  %v1558_v31 = vld [vmem:[%s2024_s30 + $0x30] ss:$8 sps:$4 sm:$0xff]   ;;  %v1560_v33 = vld [vmem:[%s2024_s30 + $0x44] ss:$8 sps:$4 sm:$0xff]   ;;  %p1728_p5 = pnand %p1727_p0, %p1721_p4 }
  0x7b   : > { %807 = vmatprep.subr.bf16.mxu0 %v1813_v0  ;;  %1401 = vmatprep.subr.bf16.mxu1 %v1813_v0  ;;  %v1559_v32 = vld [vmem:[%s2024_s30 + $0x130] ss:$8 sps:$4 sm:$0xff]   ;;  %v1562_v34 = vld [vmem:[%s2024_s30 + $0x144] ss:$8 sps:$4 sm:$0xff]   ;;  %v1564_v35 = vld [vmem:[%s2024_s30 + $0x40] ss:$8 sps:$4 sm:$0xff]  }
  0x7c   : > { %v1565_v36 = vld [vmem:[%s2024_s30 + $0x140] ss:$8 sps:$4 sm:$0xff]   ;;  %v1566_v37 = vld [vmem:[%s2024_s30 + $0x54] ss:$8 sps:$4 sm:$0xff]   ;;  %v1570_v39 = vld [vmem:[%s2024_s30 + $0x50] ss:$8 sps:$4 sm:$0xff]  }
  0x7d   : > { %v1568_v38 = vld [vmem:[%s2024_s30 + $0x154] ss:$8 sps:$4 sm:$0xff]   ;;  %v1571_v40 = vld [vmem:[%s2024_s30 + $0x150] ss:$8 sps:$4 sm:$0xff]   ;;  %v1572_v41 = vld [vmem:[%s2024_s30 + $0x64] ss:$8 sps:$4 sm:$0xff]  }
  0x7e   : > { %808 = vmatpush1.bf16.msra.mxu0 %v1523_v4  ;;  %1417 = vmatpush1.bf16.msra.mxu1 %v1523_v4  ;;  %v1574_v42 = vld [vmem:[%s2024_s30 + $0x164] ss:$8 sps:$4 sm:$0xff]   ;;  %v1576_v43 = vld [vmem:[%s2024_s30 + $0x60] ss:$8 sps:$4 sm:$0xff]   ;;  %v1578_v45 = vld [vmem:[%s2024_s30 + $0x74] ss:$8 sps:$4 sm:$0xff]  }
  0x7f   : > { %809 = vmatprep.subr.bf16.mxu0 %v1813_v0  ;;  %1402 = vmatprep.subr.bf16.mxu1 %v1813_v0  ;;  %v1577_v44 = vld [vmem:[%s2024_s30 + $0x160] ss:$8 sps:$4 sm:$0xff]   ;;  %v1580_v46 = vld [vmem:[%s2024_s30 + $0x174] ss:$8 sps:$4 sm:$0xff]   ;;  %v1582_v47 = vld [vmem:[%s2024_s30 + $0x70] ss:$8 sps:$4 sm:$0xff]  }
  0x80   : > { %v1583_v48 = vld [vmem:[%s2024_s30 + $0x170] ss:$8 sps:$4 sm:$0xff]   ;;  %v1584_v49 = vld [vmem:[%s2024_s30 + $0x84] ss:$8 sps:$4 sm:$0xff]   ;;  %v1588_v51 = vld [vmem:[%s2024_s30 + $0x80] ss:$8 sps:$4 sm:$0xff]  }
  0x81   : > { %v1586_v50 = vld [vmem:[%s2024_s30 + $0x184] ss:$8 sps:$4 sm:$0xff]   ;;  %v1589_v52 = vld [vmem:[%s2024_s30 + $0x180] ss:$8 sps:$4 sm:$0xff]   ;;  %v1590_v53 = vld [vmem:[%s2024_s30 + $0x94] ss:$8 sps:$4 sm:$0xff]  }
  0x82   : > { %810 = vmatpush1.bf16.msra.mxu0 %v1524_v5  ;;  %1418 = vmatpush1.bf16.msra.mxu1 %v1524_v5  ;;  %v1592_v54 = vld [vmem:[%s2024_s30 + $0x194] ss:$8 sps:$4 sm:$0xff]   ;;  %v1594_v55 = vld [vmem:[%s2024_s30 + $0x90] ss:$8 sps:$4 sm:$0xff]   ;;  %v1596_v57 = vld [vmem:[%s2024_s30 + $0xa4] ss:$8 sps:$4 sm:$0xff]  }
  0x83   : > { %811 = vmatprep.subr.bf16.mxu0 %v1813_v0  ;;  %1403 = vmatprep.subr.bf16.mxu1 %v1813_v0  ;;  %v1595_v56 = vld [vmem:[%s2024_s30 + $0x190] ss:$8 sps:$4 sm:$0xff]   ;;  %v1598_v58 = vld [vmem:[%s2024_s30 + $0x1a4] ss:$8 sps:$4 sm:$0xff]   ;;  %v1600_v59 = vld [vmem:[%s2024_s30 + $0xa0] ss:$8 sps:$4 sm:$0xff]  }
  0x84   : > { %v1601_v60 = vld [vmem:[%s2024_s30 + $0x1a0] ss:$8 sps:$4 sm:$0xff]   ;;  %v1602_v61 = vld [vmem:[%s2024_s30 + $0xb4] ss:$8 sps:$4 sm:$0xff]   ;;  %v1606_v63 = vld [vmem:[%s2024_s30 + $0xb0] ss:$8 sps:$4 sm:$0xff]  }
  0x85   : > { %v1604_v62 = vld [vmem:[%s2024_s30 + $0x1b4] ss:$8 sps:$4 sm:$0xff]   ;;  %v1608_v1 = vld [vmem:[%s2024_s30 + $0xc4] ss:$8 sps:$4 sm:$0xff]   ;;  %v1612_v3 = vld [vmem:[%s2024_s30 + $0xc0] ss:$8 sps:$4 sm:$0xff]  }
  0x86   : > { %812 = vmatpush1.bf16.msra.mxu0 %v1525_v7  ;;  %1419 = vmatpush1.bf16.msra.mxu1 %v1525_v7  ;;  %v1610_v2 = vld [vmem:[%s2024_s30 + $0x1c4] ss:$8 sps:$4 sm:$0xff]   ;;  %v1613_v4 = vld [vmem:[%s2024_s30 + $0x1c0] ss:$8 sps:$4 sm:$0xff]   ;;  %v1614_v5 = vld [vmem:[%s2024_s30 + $0xd4] ss:$8 sps:$4 sm:$0xff]  }
  0x87   : > { %813 = vmatprep.subr.bf16.mxu0 %v1813_v0  ;;  %1404 = vmatprep.subr.bf16.mxu1 %v1813_v0  ;;  %v1616_v6 = vld [vmem:[%s2024_s30 + $0x1d4] ss:$8 sps:$4 sm:$0xff]   ;;  %v1618_v7 = vld [vmem:[%s2024_s30 + $0xd0] ss:$8 sps:$4 sm:$0xff]  }
  0x88   : > { %v1619_v8 = vld [vmem:[%s2024_s30 + $0x1d0] ss:$8 sps:$4 sm:$0xff]  }
  0x8a   : > { %814 = vmatpush1.bf16.msra.mxu0 %v1526_v9  ;;  %1420 = vmatpush1.bf16.msra.mxu1 %v1526_v9  ;;  %v1620_v9 = vld [vmem:[%s2024_s30 + $0xe4] ss:$8 sps:$4 sm:$0xff]  }
  0x8b   : > { %815 = vmatprep.subr.bf16.mxu0 %v1813_v0  ;;  %1405 = vmatprep.subr.bf16.mxu1 %v1813_v0 }
  0x8e   : > { %816 = vmatpush1.bf16.msra.mxu0 %v1527_v10  ;;  %1421 = vmatpush1.bf16.msra.mxu1 %v1527_v10  ;;  %v1622_v10 = vld [vmem:[%s2024_s30 + $0x1e4] ss:$8 sps:$4 sm:$0xff]  }
  0x8f   : > { %817 = vmatprep.subr.bf16.mxu0 %v1813_v0  ;;  %1406 = vmatprep.subr.bf16.mxu1 %v1813_v0 }
  0x92   : > { %818 = vmatpush1.bf16.msra.mxu0 %v1528_v11  ;;  %1422 = vmatpush1.bf16.msra.mxu1 %v1528_v11  ;;  %v1624_v11 = vld [vmem:[%s2024_s30 + $0xe0] ss:$8 sps:$4 sm:$0xff]  }
  0x93   : > { %819 = vmatprep.subr.bf16.mxu0 %v1813_v0  ;;  %1407 = vmatprep.subr.bf16.mxu1 %v1813_v0 }
  0x96   : > { %820 = vmatpush1.bf16.msra.mxu0 %v1529_v12  ;;  %1423 = vmatpush1.bf16.msra.mxu1 %v1529_v12  ;;  %v1625_v12 = vld [vmem:[%s2024_s30 + $0x1e0] ss:$8 sps:$4 sm:$0xff]  }
  0x97   : > { %821 = vmatprep.subr.bf16.mxu0 %v1813_v0  ;;  %1408 = vmatprep.subr.bf16.mxu1 %v1813_v0 }
  0x9a   : > { %822 = vmatpush1.bf16.msra.mxu0 %v1530_v13  ;;  %1424 = vmatpush1.bf16.msra.mxu1 %v1530_v13  ;;  %v1626_v13 = vld [vmem:[%s2024_s30 + $0xf4] ss:$8 sps:$4 sm:$0xff]  }
  0x9b   : > { %823 = vmatprep.subr.bf16.mxu0 %v1813_v0  ;;  %1409 = vmatprep.subr.bf16.mxu1 %v1813_v0 }
  0x9e   : > { %824 = vmatpush1.bf16.msra.mxu0 %v1531_v14  ;;  %1425 = vmatpush1.bf16.msra.mxu1 %v1531_v14  ;;  %v1628_v14 = vld [vmem:[%s2024_s30 + $0x1f4] ss:$8 sps:$4 sm:$0xff]  }
  0x9f   : > { %825 = vmatprep.subr.bf16.mxu0 %v1813_v0  ;;  %1410 = vmatprep.subr.bf16.mxu1 %v1813_v0 }
  0xa2   : > { %826 = vmatpush1.bf16.msra.mxu0 %v1532_v15  ;;  %1426 = vmatpush1.bf16.msra.mxu1 %v1532_v15  ;;  %v1630_v15 = vld [vmem:[%s2024_s30 + $0xf0] ss:$8 sps:$4 sm:$0xff]  }
  0xa3   : > { %827 = vmatprep.subr.bf16.mxu0 %v1813_v0  ;;  %1411 = vmatprep.subr.bf16.mxu1 %v1813_v0 }
  0xa6   : > { %828 = vmatpush1.bf16.msra.mxu0 %v1533_v16  ;;  %1427 = vmatpush1.bf16.msra.mxu1 %v1533_v16  ;;  %v1631_v16 = vld [vmem:[%s2024_s30 + $0x1f0] ss:$8 sps:$4 sm:$0xff]  }
  0xa7   : > { %829 = vmatprep.subr.bf16.mxu0 %v1813_v0  ;;  %1412 = vmatprep.subr.bf16.mxu1 %v1813_v0 }
  0xaa   : > { %830 = vmatpush1.bf16.msra.mxu0 %v1534_v17  ;;  %1428 = vmatpush1.bf16.msra.mxu1 %v1534_v17  ;;  %v2130_v17 = vld [vmem:[#allocation7] ss:$0 sm:$0xff] }
  0xab   : > { %831 = vmatprep.subr.bf16.mxu0 %v1813_v0  ;;  %1413 = vmatprep.subr.bf16.mxu1 %v1813_v0  ;;  %v1607_v0 = vld [vmem:[%s2024_s30 + $0x1b0] ss:$8 sps:$4 sm:$0xff]  }
  0xae   : > { %832 = vmatpush1.bf16.msra.mxu0 %v1535_v18  ;;  %1429 = vmatpush1.bf16.msra.mxu1 %v1535_v18 }
  0xb1   : > { %834 = vmatmul.mubr.bf16.vlgmr.msra.gmra.mrb[0].mxu0 %v1536_v19  ;;  %962 = vmatmul.mubr.bf16.vlgmr.msra.gmra.mrb[0].mxu1 %v1539_v20 }
  0xb2   : > { %841 = vmatprep.mubr.bf16.mxu0 %v1542_v21  ;;  %969 = vmatprep.mubr.bf16.mxu1 %v1544_v22 }
  0xb9   : > { %842 = vmatmul.mubr.bf16.gmra.mrb[4].mxu0 %v1546_v23  ;;  %970 = vmatmul.mubr.bf16.gmra.mrb[4].mxu1 %v1547_v24 }
  0xba   : > { %849 = vmatprep.mubr.bf16.mxu0 %v1548_v25  ;;  %977 = vmatprep.mubr.bf16.mxu1 %v1550_v26 }
  0xc1   : > { %850 = vmatmul.mubr.bf16.gmra.mrb[8].mxu0 %v1552_v27  ;;  %978 = vmatmul.mubr.bf16.gmra.mrb[8].mxu1 %v1553_v28 }
  0xc2   : > { %857 = vmatprep.mubr.bf16.mxu0 %v1554_v29  ;;  %985 = vmatprep.mubr.bf16.mxu1 %v1556_v30 }
  0xc9   : > { %858 = vmatmul.mubr.bf16.gmra.mrb[12].mxu0 %v1558_v31  ;;  %986 = vmatmul.mubr.bf16.gmra.mrb[12].mxu1 %v1559_v32 }
  0xca   : > { %865 = vmatprep.mubr.bf16.mxu0 %v1560_v33  ;;  %993 = vmatprep.mubr.bf16.mxu1 %v1562_v34 }
  0xd1   : > { %866 = vmatmul.mubr.bf16.gmra.mrb[16].mxu0 %v1564_v35  ;;  %994 = vmatmul.mubr.bf16.gmra.mrb[16].mxu1 %v1565_v36 }
  0xd2   : > { %873 = vmatprep.mubr.bf16.mxu0 %v1566_v37  ;;  %1001 = vmatprep.mubr.bf16.mxu1 %v1568_v38 }
  0xd9   : > { %874 = vmatmul.mubr.bf16.gmra.mrb[20].mxu0 %v1570_v39  ;;  %1002 = vmatmul.mubr.bf16.gmra.mrb[20].mxu1 %v1571_v40 }
  0xda   : > { %881 = vmatprep.mubr.bf16.mxu0 %v1572_v41  ;;  %1009 = vmatprep.mubr.bf16.mxu1 %v1574_v42 }
  0xe1   : > { %882 = vmatmul.mubr.bf16.gmra.mrb[24].mxu0 %v1576_v43  ;;  %1010 = vmatmul.mubr.bf16.gmra.mrb[24].mxu1 %v1577_v44 }
  0xe2   : > { %889 = vmatprep.mubr.bf16.mxu0 %v1578_v45  ;;  %1017 = vmatprep.mubr.bf16.mxu1 %v1580_v46 }
  0xe9   : > { %890 = vmatmul.mubr.bf16.gmra.mrb[28].mxu0 %v1582_v47  ;;  %1018 = vmatmul.mubr.bf16.gmra.mrb[28].mxu1 %v1583_v48 }
  0xea   : > { %897 = vmatprep.mubr.bf16.mxu0 %v1584_v49  ;;  %1025 = vmatprep.mubr.bf16.mxu1 %v1586_v50 }
  0xf1   : > { %898 = vmatmul.mubr.bf16.gmra.mrb[32].mxu0 %v1588_v51  ;;  %1026 = vmatmul.mubr.bf16.gmra.mrb[32].mxu1 %v1589_v52 }
  0xf2   : > { %905 = vmatprep.mubr.bf16.mxu0 %v1590_v53  ;;  %1033 = vmatprep.mubr.bf16.mxu1 %v1592_v54 }
  0xf9   : > { %906 = vmatmul.mubr.bf16.gmra.mrb[36].mxu0 %v1594_v55  ;;  %1034 = vmatmul.mubr.bf16.gmra.mrb[36].mxu1 %v1595_v56 }
  0xfa   : > { %913 = vmatprep.mubr.bf16.mxu0 %v1596_v57  ;;  %1041 = vmatprep.mubr.bf16.mxu1 %v1598_v58 }
 0x101   : > { %914 = vmatmul.mubr.bf16.gmra.mrb[40].mxu0 %v1600_v59  ;;  %1042 = vmatmul.mubr.bf16.gmra.mrb[40].mxu1 %v1601_v60 }
 0x102   : > { %921 = vmatprep.mubr.bf16.mxu0 %v1602_v61  ;;  %1049 = vmatprep.mubr.bf16.mxu1 %v1604_v62 }
 0x109   : > { %922 = vmatmul.mubr.bf16.gmra.mrb[44].mxu0 %v1606_v63  ;;  %1050 = vmatmul.mubr.bf16.gmra.mrb[44].mxu1 %v1607_v0 }
 0x10a   : > { %929 = vmatprep.mubr.bf16.mxu0 %v1608_v1  ;;  %1057 = vmatprep.mubr.bf16.mxu1 %v1610_v2 }
 0x111   : > { %930 = vmatmul.mubr.bf16.gmra.mrb[48].mxu0 %v1612_v3  ;;  %1058 = vmatmul.mubr.bf16.gmra.mrb[48].mxu1 %v1613_v4 }
 0x112   : > { %937 = vmatprep.mubr.bf16.mxu0 %v1614_v5  ;;  %1065 = vmatprep.mubr.bf16.mxu1 %v1616_v6 }
 0x119   : > { %938 = vmatmul.mubr.bf16.gmra.mrb[52].mxu0 %v1618_v7  ;;  %1066 = vmatmul.mubr.bf16.gmra.mrb[52].mxu1 %v1619_v8 }
 0x11a   : > { %945 = vmatprep.mubr.bf16.mxu0 %v1620_v9  ;;  %1073 = vmatprep.mubr.bf16.mxu1 %v1622_v10 }
 0x121   : > { %946 = vmatmul.mubr.bf16.gmra.mrb[56].mxu0 %v1624_v11  ;;  %1074 = vmatmul.mubr.bf16.gmra.mrb[56].mxu1 %v1625_v12 }
 0x122   : > { %953 = vmatprep.mubr.bf16.mxu0 %v1626_v13  ;;  %1081 = vmatprep.mubr.bf16.mxu1 %v1628_v14 }
 0x129   : > { %954 = vmatmul.mubr.bf16.gmra.mrb[60].mxu0 %v1630_v15  ;;  %1082 = vmatmul.mubr.bf16.gmra.mrb[60].mxu1 %v1631_v16 }
 0x184   : > { %v835_v18 = vpop.f32.mrb[0].mxu0  ;;  %v963_v19 = vpop.f32.mrb[0].mxu1 }
 0x185   : > { %v836_v20 = vadd.f32 %v2130_v17, %v835_v18  ;;  %v964_v21 = vadd.f32 %v2130_v17, %v963_v19  ;;  %v837_v22 = vpop.f32.mrb[1].mxu0  ;;  %v965_v23 = vpop.f32.mrb[1].mxu1 }
 0x186   : > { %v838_v24 = vpop.f32.mrb[2].mxu0  ;;  %v966_v25 = vpop.f32.mrb[2].mxu1 }
 0x187   : > { %1090 = vst [vmem:[%s2136_s20] sm:$0xff] %v836_v20  ;;  %1122 = vst [vmem:[%s2136_s20 + $0x100] sm:$0xff] %v964_v21  ;;  %v839_v26 = vadd.f32 %v2130_v17, %v838_v24  ;;  %v967_v27 = vadd.f32 %v2130_v17, %v966_v25  ;;  %v840_v28 = vpop.f32.mrb[3].mxu0  ;;  %v968_v29 = vpop.f32.mrb[3].mxu1 }
 0x189   : > { %1091 = vst [vmem:[%s2136_s20 + $0x8] sm:$0xff] %v839_v26  ;;  %1123 = vst [vmem:[%s2136_s20 + $0x108] sm:$0xff] %v967_v27 }
 0x18c   : > { %v843_v30 = vpop.f32.mrb[4].mxu0  ;;  %v971_v31 = vpop.f32.mrb[4].mxu1 }
 0x18d   : > { %v844_v32 = vadd.f32 %v2130_v17, %v843_v30  ;;  %v972_v33 = vadd.f32 %v2130_v17, %v971_v31  ;;  %v845_v34 = vpop.f32.mrb[5].mxu0  ;;  %v973_v35 = vpop.f32.mrb[5].mxu1 }
 0x18e   : > { %v846_v36 = vpop.f32.mrb[6].mxu0  ;;  %v974_v37 = vpop.f32.mrb[6].mxu1 }
 0x18f   : > { %1092 = vst [vmem:[%s2136_s20 + $0x10] sm:$0xff] %v844_v32  ;;  %1124 = vst [vmem:[%s2136_s20 + $0x110] sm:$0xff] %v972_v33  ;;  %v847_v38 = vadd.f32 %v2130_v17, %v846_v36  ;;  %v975_v39 = vadd.f32 %v2130_v17, %v974_v37  ;;  %v848_v40 = vpop.f32.mrb[7].mxu0  ;;  %v976_v41 = vpop.f32.mrb[7].mxu1 }
 0x191   : > { %1093 = vst [vmem:[%s2136_s20 + $0x18] sm:$0xff] %v847_v38  ;;  %1125 = vst [vmem:[%s2136_s20 + $0x118] sm:$0xff] %v975_v39 }
 0x194   : > { %v851_v42 = vpop.f32.mrb[8].mxu0  ;;  %v979_v43 = vpop.f32.mrb[8].mxu1 }
 0x195   : > { %v852_v44 = vadd.f32 %v2130_v17, %v851_v42  ;;  %v980_v45 = vadd.f32 %v2130_v17, %v979_v43  ;;  %v853_v46 = vpop.f32.mrb[9].mxu0  ;;  %v981_v47 = vpop.f32.mrb[9].mxu1 }
 0x196   : > { %v854_v48 = vpop.f32.mrb[10].mxu0  ;;  %v982_v49 = vpop.f32.mrb[10].mxu1 }
 0x197   : > { %1094 = vst [vmem:[%s2136_s20 + $0x20] sm:$0xff] %v852_v44  ;;  %1126 = vst [vmem:[%s2136_s20 + $0x120] sm:$0xff] %v980_v45  ;;  %v855_v50 = vadd.f32 %v2130_v17, %v854_v48  ;;  %v983_v51 = vadd.f32 %v2130_v17, %v982_v49  ;;  %v856_v52 = vpop.f32.mrb[11].mxu0  ;;  %v984_v53 = vpop.f32.mrb[11].mxu1 }
 0x199   : > { %1095 = vst [vmem:[%s2136_s20 + $0x28] sm:$0xff] %v855_v50  ;;  %1127 = vst [vmem:[%s2136_s20 + $0x128] sm:$0xff] %v983_v51 }
 0x19c   : > { %v859_v54 = vpop.f32.mrb[12].mxu0  ;;  %v987_v55 = vpop.f32.mrb[12].mxu1 }
 0x19d   : > { %v860_v56 = vadd.f32 %v2130_v17, %v859_v54  ;;  %v988_v57 = vadd.f32 %v2130_v17, %v987_v55  ;;  %v861_v58 = vpop.f32.mrb[13].mxu0  ;;  %v989_v59 = vpop.f32.mrb[13].mxu1 }
 0x19e   : > { %v862_v60 = vpop.f32.mrb[14].mxu0  ;;  %v990_v61 = vpop.f32.mrb[14].mxu1 }
 0x19f   : > { %1096 = vst [vmem:[%s2136_s20 + $0x30] sm:$0xff] %v860_v56  ;;  %1128 = vst [vmem:[%s2136_s20 + $0x130] sm:$0xff] %v988_v57  ;;  %v863_v62 = vadd.f32 %v2130_v17, %v862_v60  ;;  %v991_v63 = vadd.f32 %v2130_v17, %v990_v61  ;;  %v864_v0 = vpop.f32.mrb[15].mxu0  ;;  %v992_v1 = vpop.f32.mrb[15].mxu1 }
 0x1a1   : > { %1097 = vst [vmem:[%s2136_s20 + $0x38] sm:$0xff] %v863_v62  ;;  %1129 = vst [vmem:[%s2136_s20 + $0x138] sm:$0xff] %v991_v63 }
 0x1a4   : > { %v867_v2 = vpop.f32.mrb[16].mxu0  ;;  %v995_v3 = vpop.f32.mrb[16].mxu1 }
 0x1a5   : > { %v868_v4 = vadd.f32 %v2130_v17, %v867_v2  ;;  %v996_v5 = vadd.f32 %v2130_v17, %v995_v3  ;;  %v869_v6 = vpop.f32.mrb[17].mxu0  ;;  %v997_v7 = vpop.f32.mrb[17].mxu1 }
 0x1a6   : > { %v870_v8 = vpop.f32.mrb[18].mxu0  ;;  %v998_v9 = vpop.f32.mrb[18].mxu1 }
 0x1a7   : > { %1098 = vst [vmem:[%s2136_s20 + $0x40] sm:$0xff] %v868_v4  ;;  %1130 = vst [vmem:[%s2136_s20 + $0x140] sm:$0xff] %v996_v5  ;;  %v871_v10 = vadd.f32 %v2130_v17, %v870_v8  ;;  %v999_v11 = vadd.f32 %v2130_v17, %v998_v9  ;;  %v872_v12 = vpop.f32.mrb[19].mxu0  ;;  %v1000_v13 = vpop.f32.mrb[19].mxu1 }
 0x1a9   : > { %1099 = vst [vmem:[%s2136_s20 + $0x48] sm:$0xff] %v871_v10  ;;  %1131 = vst [vmem:[%s2136_s20 + $0x148] sm:$0xff] %v999_v11 }
 0x1ac   : > { %v875_v14 = vpop.f32.mrb[20].mxu0  ;;  %v1003_v15 = vpop.f32.mrb[20].mxu1 }
 0x1ad   : > { %v876_v16 = vadd.f32 %v2130_v17, %v875_v14  ;;  %v1004_v18 = vadd.f32 %v2130_v17, %v1003_v15  ;;  %v877_v19 = vpop.f32.mrb[21].mxu0  ;;  %v1005_v20 = vpop.f32.mrb[21].mxu1 }
 0x1ae   : > { %v878_v21 = vpop.f32.mrb[22].mxu0  ;;  %v1006_v22 = vpop.f32.mrb[22].mxu1 }
 0x1af   : > { %1100 = vst [vmem:[%s2136_s20 + $0x50] sm:$0xff] %v876_v16  ;;  %1132 = vst [vmem:[%s2136_s20 + $0x150] sm:$0xff] %v1004_v18  ;;  %v879_v23 = vadd.f32 %v2130_v17, %v878_v21  ;;  %v1007_v24 = vadd.f32 %v2130_v17, %v1006_v22  ;;  %v880_v25 = vpop.f32.mrb[23].mxu0  ;;  %v1008_v26 = vpop.f32.mrb[23].mxu1 }
 0x1b1   : > { %1101 = vst [vmem:[%s2136_s20 + $0x58] sm:$0xff] %v879_v23  ;;  %1133 = vst [vmem:[%s2136_s20 + $0x158] sm:$0xff] %v1007_v24 }
 0x1b4   : > { %v883_v27 = vpop.f32.mrb[24].mxu0  ;;  %v1011_v28 = vpop.f32.mrb[24].mxu1 }
 0x1b5   : > { %v884_v29 = vadd.f32 %v2130_v17, %v883_v27  ;;  %v1012_v30 = vadd.f32 %v2130_v17, %v1011_v28  ;;  %v885_v31 = vpop.f32.mrb[25].mxu0  ;;  %v1013_v32 = vpop.f32.mrb[25].mxu1 }
 0x1b6   : > { %v886_v33 = vpop.f32.mrb[26].mxu0  ;;  %v1014_v34 = vpop.f32.mrb[26].mxu1 }
 0x1b7   : > { %1102 = vst [vmem:[%s2136_s20 + $0x60] sm:$0xff] %v884_v29  ;;  %1134 = vst [vmem:[%s2136_s20 + $0x160] sm:$0xff] %v1012_v30  ;;  %v887_v35 = vadd.f32 %v2130_v17, %v886_v33  ;;  %v1015_v36 = vadd.f32 %v2130_v17, %v1014_v34  ;;  %v888_v37 = vpop.f32.mrb[27].mxu0  ;;  %v1016_v38 = vpop.f32.mrb[27].mxu1 }
 0x1b9   : > { %1103 = vst [vmem:[%s2136_s20 + $0x68] sm:$0xff] %v887_v35  ;;  %1135 = vst [vmem:[%s2136_s20 + $0x168] sm:$0xff] %v1015_v36 }
 0x1bc   : > { %v891_v39 = vpop.f32.mrb[28].mxu0  ;;  %v1019_v40 = vpop.f32.mrb[28].mxu1 }
 0x1bd   : > { %v892_v41 = vadd.f32 %v2130_v17, %v891_v39  ;;  %v1020_v42 = vadd.f32 %v2130_v17, %v1019_v40  ;;  %v893_v43 = vpop.f32.mrb[29].mxu0  ;;  %v1021_v44 = vpop.f32.mrb[29].mxu1 }
 0x1be   : > { %v894_v45 = vpop.f32.mrb[30].mxu0  ;;  %v1022_v46 = vpop.f32.mrb[30].mxu1 }
 0x1bf   : > { %1104 = vst [vmem:[%s2136_s20 + $0x70] sm:$0xff] %v892_v41  ;;  %1136 = vst [vmem:[%s2136_s20 + $0x170] sm:$0xff] %v1020_v42  ;;  %v895_v47 = vadd.f32 %v2130_v17, %v894_v45  ;;  %v1023_v48 = vadd.f32 %v2130_v17, %v1022_v46  ;;  %v896_v49 = vpop.f32.mrb[31].mxu0  ;;  %v1024_v50 = vpop.f32.mrb[31].mxu1 }
 0x1c1   : > { %1105 = vst [vmem:[%s2136_s20 + $0x78] sm:$0xff] %v895_v47  ;;  %1137 = vst [vmem:[%s2136_s20 + $0x178] sm:$0xff] %v1023_v48 }
 0x1c4   : > { %v899_v51 = vpop.f32.mrb[32].mxu0  ;;  %v1027_v52 = vpop.f32.mrb[32].mxu1 }
 0x1c5   : > { %v900_v53 = vadd.f32 %v2130_v17, %v899_v51  ;;  %v1028_v54 = vadd.f32 %v2130_v17, %v1027_v52  ;;  %v901_v55 = vpop.f32.mrb[33].mxu0  ;;  %v1029_v56 = vpop.f32.mrb[33].mxu1 }
 0x1c6   : > { %v902_v57 = vpop.f32.mrb[34].mxu0  ;;  %v1030_v58 = vpop.f32.mrb[34].mxu1 }
 0x1c7   : > { %1106 = vst [vmem:[%s2136_s20 + $0x80] sm:$0xff] %v900_v53  ;;  %1138 = vst [vmem:[%s2136_s20 + $0x180] sm:$0xff] %v1028_v54  ;;  %v903_v59 = vadd.f32 %v2130_v17, %v902_v57  ;;  %v1031_v60 = vadd.f32 %v2130_v17, %v1030_v58  ;;  %v904_v61 = vpop.f32.mrb[35].mxu0  ;;  %v1032_v62 = vpop.f32.mrb[35].mxu1 }
 0x1c9   : > { %1107 = vst [vmem:[%s2136_s20 + $0x88] sm:$0xff] %v903_v59  ;;  %1139 = vst [vmem:[%s2136_s20 + $0x188] sm:$0xff] %v1031_v60 }
 0x1cc   : > { %v907_v63 = vpop.f32.mrb[36].mxu0  ;;  %v1035_v0 = vpop.f32.mrb[36].mxu1 }
 0x1cd   : > { %v908_v1 = vadd.f32 %v2130_v17, %v907_v63  ;;  %v1036_v2 = vadd.f32 %v2130_v17, %v1035_v0  ;;  %v909_v3 = vpop.f32.mrb[37].mxu0  ;;  %v1037_v4 = vpop.f32.mrb[37].mxu1 }
 0x1ce   : > { %v910_v5 = vpop.f32.mrb[38].mxu0  ;;  %v1038_v6 = vpop.f32.mrb[38].mxu1 }
 0x1cf   : > { %1108 = vst [vmem:[%s2136_s20 + $0x90] sm:$0xff] %v908_v1  ;;  %1140 = vst [vmem:[%s2136_s20 + $0x190] sm:$0xff] %v1036_v2  ;;  %v911_v7 = vadd.f32 %v2130_v17, %v910_v5  ;;  %v1039_v8 = vadd.f32 %v2130_v17, %v1038_v6  ;;  %v912_v9 = vpop.f32.mrb[39].mxu0  ;;  %v1040_v10 = vpop.f32.mrb[39].mxu1 }
 0x1d1   : > { %1109 = vst [vmem:[%s2136_s20 + $0x98] sm:$0xff] %v911_v7  ;;  %1141 = vst [vmem:[%s2136_s20 + $0x198] sm:$0xff] %v1039_v8 }
 0x1d4   : > { %v915_v11 = vpop.f32.mrb[40].mxu0  ;;  %v1043_v12 = vpop.f32.mrb[40].mxu1 }
 0x1d5   : > { %v916_v13 = vadd.f32 %v2130_v17, %v915_v11  ;;  %v1044_v14 = vadd.f32 %v2130_v17, %v1043_v12  ;;  %v917_v15 = vpop.f32.mrb[41].mxu0  ;;  %v1045_v16 = vpop.f32.mrb[41].mxu1 }
 0x1d6   : > { %v918_v18 = vpop.f32.mrb[42].mxu0  ;;  %v1046_v19 = vpop.f32.mrb[42].mxu1 }
 0x1d7   : > { %1110 = vst [vmem:[%s2136_s20 + $0xa0] sm:$0xff] %v916_v13  ;;  %1142 = vst [vmem:[%s2136_s20 + $0x1a0] sm:$0xff] %v1044_v14  ;;  %v919_v20 = vadd.f32 %v2130_v17, %v918_v18  ;;  %v1047_v21 = vadd.f32 %v2130_v17, %v1046_v19  ;;  %v920_v22 = vpop.f32.mrb[43].mxu0  ;;  %v1048_v23 = vpop.f32.mrb[43].mxu1 }
 0x1d9   : > { %1111 = vst [vmem:[%s2136_s20 + $0xa8] sm:$0xff] %v919_v20  ;;  %1143 = vst [vmem:[%s2136_s20 + $0x1a8] sm:$0xff] %v1047_v21 }
 0x1dc   : > { %v923_v24 = vpop.f32.mrb[44].mxu0  ;;  %v1051_v25 = vpop.f32.mrb[44].mxu1 }
 0x1dd   : > { %v924_v26 = vadd.f32 %v2130_v17, %v923_v24  ;;  %v1052_v27 = vadd.f32 %v2130_v17, %v1051_v25  ;;  %v925_v28 = vpop.f32.mrb[45].mxu0  ;;  %v1053_v29 = vpop.f32.mrb[45].mxu1 }
 0x1de   : > { %v926_v30 = vpop.f32.mrb[46].mxu0  ;;  %v1054_v31 = vpop.f32.mrb[46].mxu1 }
 0x1df   : > { %1112 = vst [vmem:[%s2136_s20 + $0xb0] sm:$0xff] %v924_v26  ;;  %1144 = vst [vmem:[%s2136_s20 + $0x1b0] sm:$0xff] %v1052_v27  ;;  %v927_v32 = vadd.f32 %v2130_v17, %v926_v30  ;;  %v1055_v33 = vadd.f32 %v2130_v17, %v1054_v31  ;;  %v928_v34 = vpop.f32.mrb[47].mxu0  ;;  %v1056_v35 = vpop.f32.mrb[47].mxu1 }
 0x1e1   : > { %1113 = vst [vmem:[%s2136_s20 + $0xb8] sm:$0xff] %v927_v32  ;;  %1145 = vst [vmem:[%s2136_s20 + $0x1b8] sm:$0xff] %v1055_v33 }
 0x1e4   : > { %v931_v36 = vpop.f32.mrb[48].mxu0  ;;  %v1059_v37 = vpop.f32.mrb[48].mxu1 }
 0x1e5   : > { %v932_v38 = vadd.f32 %v2130_v17, %v931_v36  ;;  %v1060_v39 = vadd.f32 %v2130_v17, %v1059_v37  ;;  %v933_v40 = vpop.f32.mrb[49].mxu0  ;;  %v1061_v41 = vpop.f32.mrb[49].mxu1 }
 0x1e6   : > { %v934_v42 = vpop.f32.mrb[50].mxu0  ;;  %v1062_v43 = vpop.f32.mrb[50].mxu1 }
 0x1e7   : > { %1114 = vst [vmem:[%s2136_s20 + $0xc0] sm:$0xff] %v932_v38  ;;  %1146 = vst [vmem:[%s2136_s20 + $0x1c0] sm:$0xff] %v1060_v39  ;;  %v935_v44 = vadd.f32 %v2130_v17, %v934_v42  ;;  %v1063_v45 = vadd.f32 %v2130_v17, %v1062_v43  ;;  %v936_v46 = vpop.f32.mrb[51].mxu0  ;;  %v1064_v47 = vpop.f32.mrb[51].mxu1 }
 0x1e9   : > { %1115 = vst [vmem:[%s2136_s20 + $0xc8] sm:$0xff] %v935_v44  ;;  %1147 = vst [vmem:[%s2136_s20 + $0x1c8] sm:$0xff] %v1063_v45 }
 0x1ec   : > { %v939_v48 = vpop.f32.mrb[52].mxu0  ;;  %v1067_v49 = vpop.f32.mrb[52].mxu1 }
 0x1ed   : > { %v940_v50 = vadd.f32 %v2130_v17, %v939_v48  ;;  %v1068_v51 = vadd.f32 %v2130_v17, %v1067_v49  ;;  %v941_v52 = vpop.f32.mrb[53].mxu0  ;;  %v1069_v53 = vpop.f32.mrb[53].mxu1 }
 0x1ee   : > { %v942_v54 = vpop.f32.mrb[54].mxu0  ;;  %v1070_v55 = vpop.f32.mrb[54].mxu1 }
 0x1ef   : > { %1116 = vst [vmem:[%s2136_s20 + $0xd0] sm:$0xff] %v940_v50  ;;  %1148 = vst [vmem:[%s2136_s20 + $0x1d0] sm:$0xff] %v1068_v51  ;;  %v943_v56 = vadd.f32 %v2130_v17, %v942_v54  ;;  %v1071_v57 = vadd.f32 %v2130_v17, %v1070_v55  ;;  %v944_v58 = vpop.f32.mrb[55].mxu0  ;;  %v1072_v59 = vpop.f32.mrb[55].mxu1 }
 0x1f1   : > { %1117 = vst [vmem:[%s2136_s20 + $0xd8] sm:$0xff] %v943_v56  ;;  %1149 = vst [vmem:[%s2136_s20 + $0x1d8] sm:$0xff] %v1071_v57 }
 0x1f4   : > { %v947_v60 = vpop.f32.mrb[56].mxu0  ;;  %v1075_v61 = vpop.f32.mrb[56].mxu1 }
 0x1f5   : > { %v948_v62 = vadd.f32 %v2130_v17, %v947_v60  ;;  %v1076_v63 = vadd.f32 %v2130_v17, %v1075_v61  ;;  %v949_v0 = vpop.f32.mrb[57].mxu0  ;;  %v1077_v1 = vpop.f32.mrb[57].mxu1 }
 0x1f6   : > { %v950_v2 = vpop.f32.mrb[58].mxu0  ;;  %v1078_v3 = vpop.f32.mrb[58].mxu1 }
 0x1f7   : > { %1118 = vst [vmem:[%s2136_s20 + $0xe0] sm:$0xff] %v948_v62  ;;  %1150 = vst [vmem:[%s2136_s20 + $0x1e0] sm:$0xff] %v1076_v63  ;;  %v951_v4 = vadd.f32 %v2130_v17, %v950_v2  ;;  %v1079_v5 = vadd.f32 %v2130_v17, %v1078_v3  ;;  %v952_v6 = vpop.f32.mrb[59].mxu0  ;;  %v1080_v7 = vpop.f32.mrb[59].mxu1 }
 0x1f9   : > { %1119 = vst [vmem:[%s2136_s20 + $0xe8] sm:$0xff] %v951_v4  ;;  %1151 = vst [vmem:[%s2136_s20 + $0x1e8] sm:$0xff] %v1079_v5 }
 0x1fc   : > { %v955_v8 = vpop.f32.mrb[60].mxu0  ;;  %v1083_v9 = vpop.f32.mrb[60].mxu1 }
 0x1fd   : > { %v956_v10 = vadd.f32 %v2130_v17, %v955_v8  ;;  %v1084_v11 = vadd.f32 %v2130_v17, %v1083_v9  ;;  %v957_v12 = vpop.f32.mrb[61].mxu0  ;;  %v1085_v13 = vpop.f32.mrb[61].mxu1 }
 0x1fe   : > { %v958_v14 = vpop.f32.mrb[62].mxu0  ;;  %v1086_v15 = vpop.f32.mrb[62].mxu1 }
 0x1ff   : > { %1120 = vst [vmem:[%s2136_s20 + $0xf0] sm:$0xff] %v956_v10  ;;  %1152 = vst [vmem:[%s2136_s20 + $0x1f0] sm:$0xff] %v1084_v11  ;;  %v959_v16 = vadd.f32 %v2130_v17, %v958_v14  ;;  %v1087_v18 = vadd.f32 %v2130_v17, %v1086_v15  ;;  %v960_v19 = vpop.f32.mrb[63].mxu0  ;;  %v1088_v20 = vpop.f32.mrb[63].mxu1 }
 0x201   : > { %1121 = vst [vmem:[%s2136_s20 + $0xf8] sm:$0xff] %v959_v16  ;;  %1153 = vst [vmem:[%s2136_s20 + $0x1f8] sm:$0xff] %v1087_v18 }
 0x202   : > { %1731 = shalt.err (!%p1728_p5)
}
 0x203   : > { %s1732_s21 = scalar_lea.hbm %s2263_s26, 8192  ;;  %s1736_s25 = scalar_lea.hbm %s2322_s3, 65536 }
 0x204   : > { %p1733_p9 = scmp.ne.s32.totalorder %s2263_s26, %s1732_s21  ;;  %p1737_p3 = scmp.lt.u32.totalorder %s2263_s26, %s2322_s3 }
 0x205   : > { %p1738_p7 = scmp.lt.u32.totalorder %s1736_s25, %s1732_s21  ;;  %p1740_p1 = scmp.lt.u32.totalorder %s1732_s21, %s2263_s26 }
 0x206   : > { %p1734_p12 = pnand %p1733_p9, %p1963_p8 }
 0x207   : > { %p1739_p10 = por %p1738_p7, %p1737_p3 }
 0x208   : > { %p1735_p11 = pneg %p1734_p12 }
 0x209   : > { %p1741_p2 = por %p1740_p1, %p1739_p10 }
 0x20b   : > { %p1742_p4 = pnand %p1741_p2, %p1735_p11 }
 0x20d   : > { %1745 = shalt.err (!%p1742_p4)
}
 0x20e   : > { %s1815_s20 = smov 128   ;;  %s1816_s22 = smov 8  }
 0x20f   : > { %1440 = dma.vmem_to_hbm [thread:$0]  (%p1963_p8), %s2265_s24, 8192, %s2263_s26, %s1155_s15, %s1815_s20, %s1815_s20, %s1816_s22  }
 0x210 PF: > { %p1462_p6 = scmp.ge.s32.totalorder %s1804_s17, 2  ;;  %s1186_s7 = sand.u32 1, %s1784_s12  }
 0x211   : > { %p2339_p13 = scmp.ne.s32.totalorder %s2330_s23, 0  ;;  %s1187_s8 = scalar_lea.sflag [#allocation4], %s1186_s7 }
 0x213   : > { %p1454_p0 = pnand %p1462_p6, %p2339_p13 }
 0x215   : > { %1779 = dma.done.wait (!%p1454_p0), %s1187_s8, 8192  }
 0x216   : > { %1781 = vsyncadd (!%p1454_p0), %s1187_s8, 4294959104  ;;  %s20_s17 = sadd.s32 1, %s1804_s17   ;;  %s2340_s12 = smov %s1788_s13 }
 0x217   : > { %p17_p5 = scmp.ge.s32.totalorder %s20_s17, 10   ;;  %s2341_s13 = smov %s1792_s14 }
 0x218   : > { %s2342_s14 = smov %s1972_s4  ;;  %s2343_s15 = smov %s1800_s16 }
 0x219   : > { %s2344_s16 = smov %s2346_s18  ;;  %19 = sbr.rel (!%p17_p5) target bundleno = 7 (0x7), region = 87 }
 0x220   :  { %1192 = vsyncpa [#allocation3], 1 }
 0x221   :  { %1194 = vsyncpa [#allocation3 + $0x1], 1 }
 0x222   :  { %1195 = vsyncpa [#allocation6], 1 }
 0x223   :  { %1196 = vsyncpa [#allocation4], 1 }
 0x224   :  { %1198 = vsyncpa [#allocation4 + $0x1], 1 }

</bundles_post_ra>
